<compile_context>
chip_gen: v6e
topology: v6e:2x2x1
jax: 0.10.0
libtpu: 0.0.40
codegen_flags: <defaults>
</compile_context>

<pallas_src>
import functools

import jax
import jax.numpy as jnp
from jax import lax
from jax.experimental import pallas as pl
from jax.experimental.pallas import tpu as pltpu


def _stable_softplus(y):
    # log(1 + exp(y)) without overflow for large y / precision loss for very negative y.
    return jnp.maximum(y, 0.0) + jnp.log(1.0 + jnp.exp(-jnp.abs(y)))


def _resident_spec(shape):
    """Constant-index BlockSpec for a VMEM-resident parameter (single-buffered)."""
    zeros = (0,) * len(shape)
    index_map = lambda i, _z=zeros: _z
    buffered = getattr(pl, "Buffered", None)
    if buffered is not None:
        try:
            # Block index never changes after step 0 -> one VMEM copy is enough
            # (saves the default double-buffer copy of every weight; matters on
            # v7x's 64 MiB VMEM for large fp_dim / latent).
            return pl.BlockSpec(shape, index_map, pipeline_mode=buffered(1))
        except TypeError:
            pass
    return pl.BlockSpec(shape, index_map)


def _value_mlp_kernel(n_hidden, *refs):
    """All compute (matmuls, bias adds, ReLU, softplus) happens here, in VMEM.

    refs layout:
      refs[0]                : x_ref   (TB, fp_dim)  native layout, batch on sublanes
      refs[1 .. n_hidden]    : hidden weights W_l (d_out, d_in)  [f32 or bf16]
      refs[1 + n_hidden]     : packed hidden biases (n_hidden, latent, 1) f32
      refs[2 + n_hidden]     : w_out  (latent, 1) f32  (or (1, latent) for MXU head)
      refs[3 + n_hidden]     : b_out  (1, 1) f32
      refs[4 + n_hidden]     : o_ref  (1, TB) f32  (lane-dense output row)
    """
    x_ref = refs[0]
    w_refs = refs[1:1 + n_hidden]
    b_hid_ref = refs[1 + n_hidden]
    w_out_ref = refs[2 + n_hidden]
    b_out_ref = refs[3 + n_hidden]
    o_ref = refs[4 + n_hidden]

    # --- first hidden layer: transposed-RHS contraction keeps x native ---
    w0 = w_refs[0][...]                                   # (latent, fp_dim)
    x = x_ref[...].astype(w0.dtype)                       # (TB, fp_dim), cast in VMEM
    z = lax.dot_general(w0, x,
                        dimension_numbers=(((1,), (1,)), ((), ())),
                        preferred_element_type=jnp.float32)   # (latent, TB) f32
    h = jnp.maximum(z + b_hid_ref[0], 0.0)                # bias broadcasts over lanes

    # --- remaining hidden layers: Linear -> ReLU (Dropout == identity, eval) ---
    for l in range(1, n_hidden):
        w = w_refs[l][...]                                # (latent, latent)
        z = jnp.dot(w, h.astype(w.dtype),
                    preferred_element_type=jnp.float32)   # (latent, TB) f32
        h = jnp.maximum(z + b_hid_ref[l], 0.0)

    # --- output layer Linear(latent, 1) -> lane-dense (1, TB) row ---
    if w_out_ref.shape[0] == 1:
        # MXU head for latent > 128: (1, latent) @ (latent, TB)
        y = jnp.dot(w_out_ref[...], h, preferred_element_type=jnp.float32)
    else:
        # VPU broadcast-multiply + cross-sublane reduce (free filler at latent<=128)
        y = jnp.sum(w_out_ref[...] * h, axis=0, keepdims=True)
    y = y + b_out_ref[...]

    o_ref[...] = _stable_softplus(y)


def value_mlp_forward(fps, weights, biases, *, batch_tile=1024,
                      matmul_dtype=jnp.bfloat16):
    """ValueMLP forward pass with a Pallas TPU kernel.

    fps:     (B, fp_dim) array (f32 or bf16; consumed in native layout).
    weights: list of (in, out) arrays, PyTorch Linear convention; last has out == 1.
    biases:  list of (1, out) arrays.
    matmul_dtype: MXU operand dtype for the hidden layers (accumulation, bias,
             ReLU and softplus always f32).  jnp.float32 for bit-exact parity.
    """
    B, fp_dim = fps.shape
    n_hidden = len(weights) - 1
    latent = weights[0].shape[1]

    # ---- parameter layout (tiny, one-time) ----
    w_hidden = [w.T.astype(matmul_dtype) for w in weights[:-1]]            # (out, in)
    b_hidden = jnp.stack([b.reshape(-1, 1).astype(jnp.float32)
                          for b in biases[:-1]], axis=0)                   # (n_hidden, latent, 1)
    if latent > 128:
        w_out = weights[-1].reshape(1, latent).astype(jnp.float32)         # MXU head
    else:
        w_out = weights[-1].astype(jnp.float32)                            # (latent, 1) VPU head
    b_out = biases[-1].reshape(1, 1).astype(jnp.float32)

    # ---- batch tile selection (multiple of 256) ----
    itemsize = jnp.dtype(fps.dtype).itemsize
    b_ceil = pl.cdiv(B, 256) * 256
    # Keep the streamed-x double buffer <= ~24 MiB: safe on v7x (64 MiB VMEM)
    # and on v5e/v6e once vmem_limit_bytes is raised below.
    max_bt_vmem = max(256, ((24 << 20) // (2 * fp_dim * itemsize)) // 256 * 256)
    bt = max(256, min(batch_tile, b_ceil, max_bt_vmem))
    # Prefer >= 2 grid steps so dimension_semantics=("parallel",) shards both
    # v7x TensorCores when the batch allows it.
    if b_ceil // bt < 2 and b_ceil >= 512:
        bt = max(256, min(bt, pl.cdiv(b_ceil // 2, 256) * 256))
    grid = (pl.cdiv(B, bt),)

    # ---- specs: stream x over the batch; params VMEM-resident, single-buffered ----
    in_specs = [pl.BlockSpec((bt, fp_dim), lambda i: (i, 0))]
    flat_args = [fps]
    for w in w_hidden:
        in_specs.append(_resident_spec(w.shape))
        flat_args.append(w)
    for p in (b_hidden, w_out, b_out):
        in_specs.append(_resident_spec(p.shape))
        flat_args.append(p)
    out_spec = pl.BlockSpec((1, bt), lambda i: (0, i))      # lane-dense output rows

    # ---- VMEM budget & cost estimate ----
    param_bytes = sum(int(a.size) * jnp.dtype(a.dtype).itemsize for a in flat_args[1:])
    act_bytes = 4 * latent * bt * 4                          # a few live f32 (latent, TB)
    vmem_needed = 2 * bt * fp_dim * itemsize + 2 * param_bytes + 2 * bt * 4 + act_bytes
    vmem_limit = int(min(64 << 20, max(32 << 20, vmem_needed + (8 << 20))))

    flops = 2 * B * (fp_dim * latent + max(0, n_hidden - 1) * latent * latent + latent)
    bytes_accessed = B * fp_dim * itemsize + param_bytes + B * 4
    cost = pl.CostEstimate(flops=int(flops), transcendentals=int(2 * B),
                           bytes_accessed=int(bytes_accessed))

    kernel = functools.partial(_value_mlp_kernel, n_hidden)

    y = pl.pallas_call(
        kernel,
        out_shape=jax.ShapeDtypeStruct((1, B), jnp.float32),
        grid=grid,
        in_specs=in_specs,
        out_specs=out_spec,
        compiler_params=pltpu.CompilerParams(
            dimension_semantics=("parallel",),
            vmem_limit_bytes=vmem_limit,
        ),
        cost_estimate=cost,
    )(*flat_args)

    # Ragged last tile: OOB batch lanes may hold garbage but cannot contaminate
    # valid lanes (batch is independent per lane) -- slice before any checks.
    return y[0].reshape(B, 1)


def _reference_forward(fps, weights, biases):
    h = fps
    for l in range(len(weights) - 1):
        h = jnp.maximum(h @ weights[l] + biases[l], 0.0)
    y = h @ weights[-1] + biases[-1]
    return _stable_softplus(y)


if __name__ == "__main__":
    # Module hyper-parameters (small, consistent with the forward pass).
    n_layers = 2          # 1 input Linear + (n_layers - 1) hidden Linears + output Linear
    fp_dim = 256
    latent_dim = 128
    batch = 300           # ragged on purpose: 2-step parallel grid + partial last tile

    key = jax.random.PRNGKey(0)
    k_x, *k_params = jax.random.split(key, 1 + 2 * (n_layers + 1))

    fps = jax.random.normal(k_x, (batch, fp_dim), dtype=jnp.float32)

    layer_dims = [(fp_dim, latent_dim)]
    for _ in range(n_layers - 1):
        layer_dims.append((latent_dim, latent_dim))
    layer_dims.append((latent_dim, 1))

    weights, biases = [], []
    for i, (d_in, d_out) in enumerate(layer_dims):
        kw, kb = k_params[2 * i], k_params[2 * i + 1]
        scale = 1.0 / (d_in ** 0.5)
        weights.append(jax.random.uniform(kw, (d_in, d_out), jnp.float32, -scale, scale))
        biases.append(jax.random.uniform(kb, (1, d_out), jnp.float32, -scale, scale))

    ref = _reference_forward(fps, weights, biases)

    # Exact f32 path: bit-close to the pure-JAX reference.
    out_f32 = value_mlp_forward(fps, weights, biases, matmul_dtype=jnp.float32)
    out_f32 = jax.block_until_ready(out_f32)
    assert out_f32.shape == (batch, 1)
    assert bool(jnp.all(jnp.isfinite(out_f32)))
    assert jnp.allclose(out_f32, ref, atol=1e-4, rtol=1e-4), "f32 kernel mismatch vs reference"

    # Default path: bf16 MXU operands, f32 accumulation (all TPU generations).
    out = value_mlp_forward(fps, weights, biases)
    out = jax.block_until_ready(out)
    assert out.shape == (batch, 1)
    assert bool(jnp.all(jnp.isfinite(out)))
    assert jnp.allclose(out, ref, atol=5e-2, rtol=5e-2), "bf16 kernel diverged"

    print("KERNEL_OK")
</pallas_src>

<mosaic_0001>
module attributes {stable_mosaic.version = 11 : i64} {
  func.func @_value_mlp_kernel(%arg0: i32, %arg1: memref<256x256xf32, #tpu.memory_space<vmem>>, %arg2: memref<128x256xf32, #tpu.memory_space<vmem>>, %arg3: memref<128x128xf32, #tpu.memory_space<vmem>>, %arg4: memref<2x128x1xf32, #tpu.memory_space<vmem>>, %arg5: memref<128x1xf32, #tpu.memory_space<vmem>>, %arg6: memref<1x1xf32, #tpu.memory_space<vmem>>, %arg7: memref<1x256xf32, #tpu.memory_space<vmem>>) attributes {dimension_semantics = [#tpu.dimension_semantics<parallel>], iteration_bounds = array<i64: 2>, scalar_prefetch = 0 : i64, scratch_operands = 0 : i64, tpu.core_type = #tpu.core_type<tc>, window_params = [{transform_indices = @transform_0, window_bounds = array<i64: 256, 256>}, {pipeline_mode = #tpu.pipeline_mode<synchronous>, transform_indices = @transform_1, window_bounds = array<i64: 128, 256>}, {pipeline_mode = #tpu.pipeline_mode<synchronous>, transform_indices = @transform_2, window_bounds = array<i64: 128, 128>}, {pipeline_mode = #tpu.pipeline_mode<synchronous>, transform_indices = @transform_3, window_bounds = array<i64: 2, 128, 1>}, {pipeline_mode = #tpu.pipeline_mode<synchronous>, transform_indices = @transform_4, window_bounds = array<i64: 128, 1>}, {pipeline_mode = #tpu.pipeline_mode<synchronous>, transform_indices = @transform_5, window_bounds = array<i64: 1, 1>}, {transform_indices = @transform_6, window_bounds = array<i64: 1, 256>}]} {
    %c0 = arith.constant 0 : index
    %c0_0 = arith.constant 0 : index
    %0 = vector.load %arg2[%c0, %c0_0] : memref<128x256xf32, #tpu.memory_space<vmem>>, vector<128x256xf32>
    %c0_1 = arith.constant 0 : index
    %c0_2 = arith.constant 0 : index
    %1 = vector.load %arg1[%c0_1, %c0_2] : memref<256x256xf32, #tpu.memory_space<vmem>>, vector<256x256xf32>
    %cst = arith.constant dense<0.000000e+00> : vector<128x256xf32>
    %2 = tpu.matmul %0, %1, %cst {dimension_numbers = #tpu.dot_dimension_numbers<[1], [1], [0], [0], [0, 0, 1, 0], [], []>} : vector<128x256xf32>, vector<256x256xf32>, vector<128x256xf32> -> vector<128x256xf32>
    %c0_3 = arith.constant 0 : index
    %c0_4 = arith.constant 0 : index
    %c0_5 = arith.constant 0 : index
    %3 = vector.load %arg4[%c0_3, %c0_4, %c0_5] : memref<2x128x1xf32, #tpu.memory_space<vmem>>, vector<1x128x1xf32>
    %4 = vector.shape_cast %3 : vector<1x128x1xf32> to vector<128x1xf32>
    %5 = vector.broadcast %4 : vector<128x1xf32> to vector<128x256xf32>
    %6 = arith.addf %2, %5 : vector<128x256xf32>
    %cst_6 = arith.constant 0.000000e+00 : f32
    %7 = vector.broadcast %cst_6 : f32 to vector<128x256xf32>
    %8 = arith.maximumf %6, %7 : vector<128x256xf32>
    %c0_7 = arith.constant 0 : index
    %c0_8 = arith.constant 0 : index
    %9 = vector.load %arg3[%c0_7, %c0_8] : memref<128x128xf32, #tpu.memory_space<vmem>>, vector<128x128xf32>
    %cst_9 = arith.constant dense<0.000000e+00> : vector<128x256xf32>
    %10 = tpu.matmul %9, %8, %cst_9 {dimension_numbers = #tpu.dot_dimension_numbers<[1], [0], [0], [1], [0, 0, 1, 1], [], []>} : vector<128x128xf32>, vector<128x256xf32>, vector<128x256xf32> -> vector<128x256xf32>
    %c1 = arith.constant 1 : index
    %c0_10 = arith.constant 0 : index
    %c0_11 = arith.constant 0 : index
    %11 = vector.load %arg4[%c1, %c0_10, %c0_11] : memref<2x128x1xf32, #tpu.memory_space<vmem>>, vector<1x128x1xf32>
    %12 = vector.shape_cast %11 : vector<1x128x1xf32> to vector<128x1xf32>
    %13 = vector.broadcast %12 : vector<128x1xf32> to vector<128x256xf32>
    %14 = arith.addf %10, %13 : vector<128x256xf32>
    %cst_12 = arith.constant 0.000000e+00 : f32
    %15 = vector.broadcast %cst_12 : f32 to vector<128x256xf32>
    %16 = arith.maximumf %14, %15 : vector<128x256xf32>
    %c0_13 = arith.constant 0 : index
    %c0_14 = arith.constant 0 : index
    %17 = vector.load %arg5[%c0_13, %c0_14] : memref<128x1xf32, #tpu.memory_space<vmem>>, vector<128x1xf32>
    %18 = vector.broadcast %17 : vector<128x1xf32> to vector<128x256xf32>
    %19 = arith.mulf %18, %16 : vector<128x256xf32>
    %cst_15 = arith.constant dense<0.000000e+00> : vector<256xf32>
    %20 = vector.multi_reduction <add>, %19, %cst_15 [0] : vector<128x256xf32> to vector<256xf32>
    %21 = vector.shape_cast %20 : vector<256xf32> to vector<1x256xf32>
    %c0_16 = arith.constant 0 : index
    %c0_17 = arith.constant 0 : index
    %22 = vector.load %arg6[%c0_16, %c0_17] : memref<1x1xf32, #tpu.memory_space<vmem>>, vector<1x1xf32>
    %23 = vector.broadcast %22 : vector<1x1xf32> to vector<1x256xf32>
    %24 = arith.addf %21, %23 : vector<1x256xf32>
    %cst_18 = arith.constant 0.000000e+00 : f32
    %25 = vector.broadcast %cst_18 : f32 to vector<1x256xf32>
    %26 = arith.maximumf %24, %25 : vector<1x256xf32>
    %27 = math.absf %24 : vector<1x256xf32>
    %cst_19 = arith.constant 0.000000e+00 : f32
    %28 = vector.broadcast %cst_19 : f32 to vector<1x256xf32>
    %29 = arith.subf %28, %27 : vector<1x256xf32>
    %30 = math.exp %29 : vector<1x256xf32>
    %cst_20 = arith.constant 1.000000e+00 : f32
    %31 = vector.broadcast %cst_20 : f32 to vector<1x256xf32>
    %32 = arith.addf %31, %30 : vector<1x256xf32>
    %33 = math.log %32 : vector<1x256xf32>
    %34 = arith.addf %26, %33 : vector<1x256xf32>
    %c0_21 = arith.constant 0 : index
    %c0_22 = arith.constant 0 : index
    %35 = vector.load %arg7[%c0_21, %c0_22] : memref<1x256xf32, #tpu.memory_space<vmem>>, vector<1x256xf32>
    tpu.vector_store %arg7[%c0_21, %c0_22], %34 {strides = array<i32>} : memref<1x256xf32, #tpu.memory_space<vmem>>, vector<1x256xf32>,
    return
  }
  func.func @transform_0(%arg0: i32) -> (i32, i32) {
    %c0_i32 = arith.constant 0 : i32
    %c0_i32_0 = arith.constant 0 : i32
    return %arg0, %c0_i32 : i32, i32
  }
  func.func @transform_1(%arg0: i32) -> (i32, i32) {
    %c0_i32 = arith.constant 0 : i32
    %c0_i32_0 = arith.constant 0 : i32
    %c0_i32_1 = arith.constant 0 : i32
    return %c0_i32, %c0_i32_0 : i32, i32
  }
  func.func @transform_2(%arg0: i32) -> (i32, i32) {
    %c0_i32 = arith.constant 0 : i32
    %c0_i32_0 = arith.constant 0 : i32
    %c0_i32_1 = arith.constant 0 : i32
    return %c0_i32, %c0_i32_0 : i32, i32
  }
  func.func @transform_3(%arg0: i32) -> (i32, i32, i32) {
    %c0_i32 = arith.constant 0 : i32
    %c0_i32_0 = arith.constant 0 : i32
    %c0_i32_1 = arith.constant 0 : i32
    %c0_i32_2 = arith.constant 0 : i32
    return %c0_i32, %c0_i32_0, %c0_i32_1 : i32, i32, i32
  }
  func.func @transform_4(%arg0: i32) -> (i32, i32) {
    %c0_i32 = arith.constant 0 : i32
    %c0_i32_0 = arith.constant 0 : i32
    %c0_i32_1 = arith.constant 0 : i32
    return %c0_i32, %c0_i32_0 : i32, i32
  }
  func.func @transform_5(%arg0: i32) -> (i32, i32) {
    %c0_i32 = arith.constant 0 : i32
    %c0_i32_0 = arith.constant 0 : i32
    %c0_i32_1 = arith.constant 0 : i32
    return %c0_i32, %c0_i32_0 : i32, i32
  }
  func.func @transform_6(%arg0: i32) -> (i32, i32) {
    %c0_i32 = arith.constant 0 : i32
    %c0_i32_0 = arith.constant 0 : i32
    return %c0_i32, %arg0 : i32, i32
  }
}

</mosaic_0001>

<bundles_post_ra>
// kernel: tpu_custom_call.1
= control target key start
LH: loop header
LB: loop body
LE: loop exit
PB: predicated region body
PF: predicated region fallthrough
CT: control target
= control target key end

     0   :  { %s2159_s0 = inlined_call_operand.hbm [shape: f32[300,256], index: 0, kind: input, shape index: {}]   ;;  %s2160_s1 = inlined_call_operand.vmem [shape: f32[128,256], index: 1, kind: input, shape index: {}]   ;;  %s2161_s2 = inlined_call_operand.vmem [shape: f32[128,128], index: 2, kind: input, shape index: {}]   ;;  %s2162_s3 = inlined_call_operand.vmem [shape: f32[2,128,1], index: 3, kind: input, shape index: {}]   ;;  %s2163_s4 = inlined_call_operand.vmem [shape: f32[128,1], index: 4, kind: input, shape index: {}]   ;;  %s2164_s5 = inlined_call_operand.<no memory space> [shape: f32[1,1], index: 5, kind: input, shape index: {}]   ;;  %s2165_s6 = inlined_call_operand.hbm [shape: f32[1,300], index: 6, kind: output, shape index: {}]  }
   0x1   :  { %v11_v0 = vstv %s2164_s5 }
   0x2   :  { %12 = vst [vmem:[#allocation2] sm:$0x1] %v11_v0 }
   0x3   :  { %13 = vsyncpa [#allocation4], 0 }
   0x4   :  { %15 = vsyncpa [#allocation4 + $0x1], 0 }
   0x5   :  { %16 = vsyncpa [#allocation5], 0 }
   0x6   :  { %18 = vsyncpa [#allocation5 + $0x1], 0  ;;  %s1528_s23 = smov 0   ;;  %s1530_s24 = smov 0  }
   0x7   :  { %s1532_s25 = smov 0   ;;  %s1534_s26 = smov 0  }
   0x8 LB: > { %s1549_s5 = sadd.s32 4294967295, %s1481_s26   ;;  %s1295_s27 = sadd.s32 4294967294, %s1481_s26   ;;  %s1481_s26 = sphi %s1534_s26, %s2175_s26   ;;  %s1477_s25 = sphi %s1532_s25, %s2174_s25   ;;  %s1473_s24 = sphi %s1530_s24, %s2173_s24   ;;  %s1469_s23 = sphi %s1528_s23, %s2172_s23  }
   0x9   : > { %s1553_s28 = sadd.s32 1, %s1481_s26   ;;  %s31_s29 = sadd.s32 1, %s1477_s25 }
   0xa   : > { %s28_s30 = ssub.s32 %s1481_s26, %s1553_s28  ;;  %p38_p0 = scmp.ne.s32.totalorder %s1477_s25, %s1473_s24 }
   0xb   : > { %p29_p1 = scmp.eq.s32.totalorder %s28_s30, 0  ;;  %p39_p2 = scmp.eq.s32.totalorder %s1481_s26, 0 }
   0xc   : > { %p44_p3 = scmp.ne.s32.totalorder %s1473_s24, %s1469_s23  ;;  %p45_p4 = scmp.eq.s32.totalorder %s1549_s5, 0 }
   0xd   : > { %s1565_s7 = scalar_select %p29_p1, %s1477_s25, %s31_s29  }
   0xe   : > { %p40_p5 = por %p39_p2, %p38_p0  ;;  %p1567_p6 = por %p45_p4, %p44_p3 }
   0xf   : > { %p173_p7 = scmp.eq.s32.totalorder %s1549_s5, 1  ;;  %p179_p8 = scmp.eq.s32.totalorder %s1295_s27, 1 }
  0x10   : > { %p2166_p11 = scmp.ge.s32.totalorder %s1481_s26, 2 }
  0x11   : > { %p1572_p9 = por %p173_p7, %p38_p0  ;;  %p1576_p10 = por %p179_p8, %p44_p3 }
  0x12   : > { %210 = sbr.rel (%p2166_p11) target bundleno = 55 (0x37), region = 36 }
  0x13   : > { %s2169_s10 = scalar_select %p1576_p10, 1, 0 }
  0x17   : > { %213 = sbr.rel (!%p40_p5) target bundleno = 55 (0x37), region = 40  ;;  %s214_s11 = sand.u32 (%p40_p5), 1, %s1477_s25  }
  0x18   : > { %s1299_s12 = sshll.u32 (%p40_p5), %s1481_s26, 5  ;;  %s1298_s13 = sshll.u32 (%p40_p5), %s214_s11, 9 }
  0x19   : > { %s220_s14 = ssub.s32 (%p40_p5), 38, %s1299_s12  ;;  %s1588_s17 = scalar_lea.sflag (%p40_p5), [#allocation4], %s214_s11 }
  0x1a   : > { %p221_p12 = scmp.lt.s32.totalorder (%p40_p5), %s220_s14, 32  ;;  %s218_s18 = scalar_lea.vmem (%p40_p5), [#allocation3], %s1298_s13 }
  0x1c   : > { %s2177_s14 = smov (!%p221_p12, %s220_s14), 32 }
  0x1d   : > { %s1585_s15 = sshll.u32 %s2177_s14, 8 }
  0x1e   : > { %s226_s16 = ssub.s32 8192, %s1585_s15 }
  0x1f   : > { %227 = vsyncadd %s1588_s17, %s226_s16  ;;  %p1302_p13 = scmp.ne.s32.totalorder %s1585_s15, 0  ;;  %s1335_s19 = sshll.u32 %s1481_s26, 13 }
  0x20   : > { %s1596_s22 = scalar_lea.hbm %s2159_s0, %s1335_s19  ;;  %s233_s27 = sshll.u32 %s218_s18, 4  ;;  %s1598_s27 = int_to_ptr.vmem [resolvable:$true] %s233_s27 }
  0x21   : > { %s1391_s29 = scalar_lea.hbm %s1596_s22, %s1585_s15  ;;  %s1395_s12 = scalar_lea.hbm %s2159_s0, 9728 }
  0x22   : > { %p1392_p0 = scmp.ne.s32.totalorder %s1596_s22, %s1391_s29  ;;  %p1396_p3 = scmp.lt.s32.totalorder %s1596_s22, %s2159_s0 }
  0x23   : > { %p1397_p4 = scmp.lt.s32.totalorder %s1395_s12, %s1391_s29 }
  0x24   : > { %p1393_p1 = pnand %p1392_p0, %p1302_p13 }
  0x25   : > { %p1398_p5 = por %p1397_p4, %p1396_p3 }
  0x26   : > { %p1394_p2 = pneg %p1393_p1 }
  0x28   : > { %p1399_p7 = pnand %p1398_p5, %p1394_p2 }
  0x2a   : > { %1402 = shalt.err (!%p1399_p7)
}
  0x2b   : > { %s1403_s16 = scalar_lea.vmem %s1598_s27, %s1585_s15  ;;  %s1483_s18 = smov [#allocation3]  }
  0x2c   : > { %p1404_p8 = scmp.ne.s32.totalorder %s1598_s27, %s1403_s16  ;;  %s1407_s19 = sshll.u32 %s1483_s18, 4  ;;  %s1408_s19 = int_to_ptr.vmem [resolvable:$false] %s1407_s19 }
  0x2d   : > { %s1409_s20 = scalar_lea.vmem %s1408_s19, 16384  ;;  %p1410_p1 = scmp.lt.s32.totalorder %s1598_s27, %s1408_s19 }
  0x2e   : > { %p1405_p12 = pnand %p1404_p8, %p1302_p13  ;;  %p1411_p11 = scmp.lt.s32.totalorder %s1409_s20, %s1403_s16 }
  0x30   : > { %p1406_p0 = pneg %p1405_p12  ;;  %p1412_p10 = por %p1411_p11, %p1410_p1 }
  0x32   : > { %p1413_p3 = pnand %p1412_p10, %p1406_p0 }
  0x34   : > { %1416 = shalt.err (!%p1413_p3)
}
  0x35   : > { %s1484_s21 = smov 256   ;;  %s1485_s29 = smov 16  }
  0x36   : > { %239 = dma.hbm_to_vmem [thread:$0]  (%p1302_p13), %s1596_s22, %s1585_s15, %s1598_s27, %s1588_s17, %s1484_s21, %s1484_s21, %s1485_s29  }
  0x37 PF: > { %p1307_p2 = scmp.ge.s32.totalorder %s1481_s26, 1  ;;  %p241_p4 = scmp.lt.s32.totalorder %s1481_s26, 3 }
  0x39   : > { %p242_p5 = pnand %p1307_p2, %p241_p4 }
  0x3a   : > { %s1627_s30 = sand.u32 (!%p242_p5), 1, %s1473_s24  }
  0x3b   : > { %245 = sbr.rel (%p242_p5) target bundleno = 835 (0x343), region = 44  ;;  %s1308_s11 = sshll.u32 (!%p242_p5), %s1627_s30, 9 }
  0x3c   : > { %s248_s12 = scalar_lea.sflag (!%p242_p5), [#allocation4], %s1627_s30  ;;  %s1631_s13 = scalar_lea.vmem (!%p242_p5), [#allocation3], %s1308_s11 }
  0x40   : > { %1460 = dma.done.wait (%p1567_p6), %s248_s12, 8192  }
  0x41   : > { %1462 = vsyncadd (%p1567_p6), %s248_s12, 4294959104  ;;  %v354_v1 = vld [vmem:[%s1631_s13 + $0xf8] sm:$0xff]  ;;  %v353_v2 = vld [vmem:[%s1631_s13 + $0xf0] sm:$0xff]  ;;  %v1486_v20 = vmov 0   ;;  %s1309_s22 = sshll.u32 %s1627_s30, 1  ;;  %s1206_s14 = scalar_lea.sflag [#allocation5], %s1627_s30 }
  0x42   : > { %v352_v3 = vld [vmem:[%s1631_s13 + $0xe8] sm:$0xff]  ;;  %483 = vmatprep.subr.mxu0 %v354_v1  ;;  %v351_v4 = vld [vmem:[%s1631_s13 + $0xe0] sm:$0xff]  ;;  %v350_v5 = vld [vmem:[%s1631_s13 + $0xd8] sm:$0xff]  ;;  %1381 = vset.pattern.permute.xlu0 %v1486_v20  ;;  %s279_s27 = scalar_lea.vmem [#allocation6], %s1309_s22  ;;  %s1327_s16 = sshll.u32 (%p1572_p9), %s1549_s5, 1 }
  0x43   : > { %484 = vmatpush1.xpose.msra.mxu0 %v353_v2  ;;  %v349_v6 = vld [vmem:[%s1631_s13 + $0xd0] sm:$0xff]  ;;  %v348_v7 = vld [vmem:[%s1631_s13 + $0xc8] sm:$0xff]  ;;  %v347_v8 = vld [vmem:[%s1631_s13 + $0xc0] sm:$0xff]  ;;  %1382 = vset.pattern.permute.xlu1 %v1486_v20  ;;  %s1214_s18 = ssub.s32 (%p1572_p9), 3, %s1327_s16 }
  0x44   : > { %485 = vmatprep.subr.mxu0 %v352_v3  ;;  %v346_v9 = vld [vmem:[%s1631_s13 + $0xb8] sm:$0xff]  ;;  %v345_v10 = vld [vmem:[%s1631_s13 + $0xb0] sm:$0xff]  ;;  %v344_v11 = vld [vmem:[%s1631_s13 + $0xa8] sm:$0xff]  ;;  %p1215_p6 = scmp.lt.s32.totalorder (%p1572_p9), %s1214_s18, 2 }
  0x45   : > { %v343_v12 = vld [vmem:[%s1631_s13 + $0xa0] sm:$0xff]  ;;  %v342_v13 = vld [vmem:[%s1631_s13 + $0x98] sm:$0xff]  ;;  %v341_v15 = vld [vmem:[%s1631_s13 + $0x90] sm:$0xff] }
  0x46   : > { %v292_v14 = vld [vmem:[%s2160_s1 + $0x8] sm:$0xff]  ;;  %v338_v18 = vld [vmem:[%s1631_s13 + $0x78] sm:$0xff]  ;;  %v337_v19 = vld [vmem:[%s1631_s13 + $0x70] sm:$0xff] }
  0x47   : > { %486 = vmatpush1.xpose.msra.mxu0 %v351_v4  ;;  %547 = vmatprep.mubr.f32.mxu0 %v292_v14  ;;  %v340_v16 = vld [vmem:[%s1631_s13 + $0x88] sm:$0xff]  ;;  %v339_v17 = vld [vmem:[%s1631_s13 + $0x80] sm:$0xff]  ;;  %v402_v22 = vld [vmem:[%s2162_s3 + $0x78] sm:$0xff] }
  0x48   : > { %487 = vmatprep.subr.mxu0 %v350_v5  ;;  %v336_v21 = vld [vmem:[%s1631_s13 + $0x68] sm:$0xff]  ;;  %480 = vperm.xlu0 %1381, %v402_v22   ;;  %v335_v23 = vld [vmem:[%s1631_s13 + $0x60] sm:$0xff]  ;;  %v334_v24 = vld [vmem:[%s1631_s13 + $0x58] sm:$0xff] }
  0x49   : > { %v401_v25 = vld [vmem:[%s2162_s3 + $0x70] sm:$0xff]  ;;  %v400_v28 = vld [vmem:[%s2162_s3 + $0x68] sm:$0xff]  ;;  %v398_v29 = vld [vmem:[%s2162_s3 + $0x58] sm:$0xff] }
  0x4a   : > { %v333_v26 = vld [vmem:[%s1631_s13 + $0x50] sm:$0xff]  ;;  %v332_v27 = vld [vmem:[%s1631_s13 + $0x48] sm:$0xff]  ;;  %470 = vperm.xlu1 %1382, %v400_v28   ;;  %v331_v30 = vld [vmem:[%s1631_s13 + $0x40] sm:$0xff] }
  0x4b   : > { %488 = vmatpush1.xpose.msra.mxu0 %v349_v6  ;;  %v330_v31 = vld [vmem:[%s1631_s13 + $0x38] sm:$0xff]  ;;  %v396_v33 = vld [vmem:[%s2162_s3 + $0x48] sm:$0xff]  ;;  %v329_v34 = vld [vmem:[%s1631_s13 + $0x30] sm:$0xff] }
  0x4c   : > { %489 = vmatprep.subr.mxu0 %v348_v7  ;;  %475 = vperm.xlu0 %1381, %v401_v25   ;;  %v399_v32 = vld [vmem:[%s2162_s3 + $0x60] sm:$0xff]  ;;  %v328_v35 = vld [vmem:[%s1631_s13 + $0x28] sm:$0xff]  ;;  %v394_v37 = vld [vmem:[%s2162_s3 + $0x38] sm:$0xff] }
  0x4d   : > { %v397_v36 = vld [vmem:[%s2162_s3 + $0x50] sm:$0xff]  ;;  %v327_v38 = vld [vmem:[%s1631_s13 + $0x20] sm:$0xff]  ;;  %v326_v39 = vld [vmem:[%s1631_s13 + $0x18] sm:$0xff] }
  0x4e   : > { %465 = vperm.xlu1 %1382, %v399_v32   ;;  %v395_v40 = vld [vmem:[%s2162_s3 + $0x40] sm:$0xff]  ;;  %v392_v41 = vld [vmem:[%s2162_s3 + $0x28] sm:$0xff]  ;;  %v325_v42 = vld [vmem:[%s1631_s13 + $0x10] sm:$0xff] }
  0x4f   : > { %490 = vmatpush1.xpose.msra.mxu0 %v347_v8  ;;  %v324_v43 = vld [vmem:[%s1631_s13 + $0x8] sm:$0xff]  ;;  %v390_v45 = vld [vmem:[%s2162_s3 + $0x18] sm:$0xff]  ;;  %v323_v46 = vld [vmem:[%s1631_s13] sm:$0xff] }
  0x50   : > { %491 = vmatprep.subr.mxu0 %v346_v9  ;;  %460 = vperm.xlu0 %1381, %v398_v29   ;;  %v393_v44 = vld [vmem:[%s2162_s3 + $0x30] sm:$0xff]  ;;  %v386_v47 = vld [vmem:[%s1631_s13 + $0x1f8] sm:$0xff]  ;;  %v388_v49 = vld [vmem:[%s2162_s3 + $0x8] sm:$0xff] }
  0x51   : > { %v391_v48 = vld [vmem:[%s2162_s3 + $0x20] sm:$0xff]  ;;  %v385_v50 = vld [vmem:[%s1631_s13 + $0x1f0] sm:$0xff]  ;;  %v384_v52 = vld [vmem:[%s1631_s13 + $0x1e8] sm:$0xff] }
  0x52   : > { %455 = vperm.xlu1 %1382, %v397_v36   ;;  %v389_v51 = vld [vmem:[%s2162_s3 + $0x10] sm:$0xff]  ;;  %v1310_v53 = vld [vmem:[%s2162_s3 + $0x80] sm:$0xff]  ;;  %v1311_v59 = vld [vmem:[%s2162_s3 + $0x88] sm:$0xff] }
  0x53   : > { %492 = vmatpush1.xpose.msra.mxu0 %v345_v10  ;;  %v383_v54 = vld [vmem:[%s1631_s13 + $0x1e0] sm:$0xff]  ;;  %v382_v56 = vld [vmem:[%s1631_s13 + $0x1d8] sm:$0xff]  ;;  %v1312_v57 = vld [vmem:[%s2162_s3 + $0x90] sm:$0xff] }
  0x54   : > { %493 = vmatprep.subr.mxu0 %v344_v11  ;;  %450 = vperm.xlu0 %1381, %v396_v33   ;;  %v387_v55 = vld [vmem:[%s2162_s3] sm:$0xff]  ;;  %v381_v58 = vld [vmem:[%s1631_s13 + $0x1d0] sm:$0xff]  ;;  %v380_v60 = vld [vmem:[%s1631_s13 + $0x1c8] sm:$0xff] }
  0x55   : > { %v982_v61 = vld [vmem:[%s2163_s4] sm:$0xff]  ;;  %v1313_v63 = vld [vmem:[%s2162_s3 + $0x98] sm:$0xff]  ;;  %v983_v3 = vld [vmem:[%s2163_s4 + $0x8] sm:$0xff] }
  0x56   : > { %445 = vperm.xlu1 %1382, %v395_v40   ;;  %v379_v62 = vld [vmem:[%s1631_s13 + $0x1c0] sm:$0xff]  ;;  %v378_v0 = vld [vmem:[%s1631_s13 + $0x1b8] sm:$0xff]  ;;  %v377_v2 = vld [vmem:[%s1631_s13 + $0x1b0] sm:$0xff] }
  0x57   : > { %494 = vmatpush1.xpose.msra.mxu0 %v343_v12  ;;  %v1314_v1 = vld [vmem:[%s2162_s3 + $0xa0] sm:$0xff]  ;;  %v376_v4 = vld [vmem:[%s1631_s13 + $0x1a8] sm:$0xff]  ;;  %v373_v10 = vld [vmem:[%s1631_s13 + $0x190] sm:$0xff] }
  0x58   : > { %495 = vmatprep.subr.mxu0 %v342_v13  ;;  %440 = vperm.xlu0 %1381, %v394_v37   ;;  %v1315_v5 = vld [vmem:[%s2162_s3 + $0xa8] sm:$0xff]  ;;  %v984_v7 = vld [vmem:[%s2163_s4 + $0x10] sm:$0xff]  ;;  %v374_v8 = vld [vmem:[%s1631_s13 + $0x198] sm:$0xff] }
  0x59   : > { %v375_v6 = vld [vmem:[%s1631_s13 + $0x1a0] sm:$0xff]  ;;  %v1316_v9 = vld [vmem:[%s2162_s3 + $0xb0] sm:$0xff]  ;;  %v985_v11 = vld [vmem:[%s2163_s4 + $0x18] sm:$0xff] }
  0x5a   : > { %435 = vperm.xlu1 %1382, %v393_v44   ;;  %v372_v12 = vld [vmem:[%s1631_s13 + $0x188] sm:$0xff]  ;;  %v1317_v13 = vld [vmem:[%s2162_s3 + $0xb8] sm:$0xff]  ;;  %v371_v14 = vld [vmem:[%s1631_s13 + $0x180] sm:$0xff] }
  0x5b   : > { %496 = vmatpush1.xpose.msra.mxu0 %v341_v15  ;;  %v986_v15 = vld [vmem:[%s2163_s4 + $0x20] sm:$0xff]  ;;  %v368_v20 = vld [vmem:[%s1631_s13 + $0x168] sm:$0xff]  ;;  %v1321_v29 = vld [vmem:[%s2162_s3 + $0xd8] sm:$0xff] }
  0x5c   : > { %497 = vmatprep.subr.mxu0 %v340_v16  ;;  %430 = vperm.xlu0 %1381, %v392_v41   ;;  %v370_v16 = vld [vmem:[%s1631_s13 + $0x178] sm:$0xff]  ;;  %v367_v22 = vld [vmem:[%s1631_s13 + $0x160] sm:$0xff]  ;;  %v1320_v25 = vld [vmem:[%s2162_s3 + $0xd0] sm:$0xff] }
  0x5d   : > { %v364_v28 = vld [vmem:[%s1631_s13 + $0x148] sm:$0xff]  ;;  %v362_v32 = vld [vmem:[%s1631_s13 + $0x138] sm:$0xff] }
  0x5e   : > { %425 = vperm.xlu1 %1382, %v391_v48   ;;  %v1322_v33 = vld [vmem:[%s2162_s3 + $0xe0] sm:$0xff]  ;;  %v360_v36 = vld [vmem:[%s1631_s13 + $0x128] sm:$0xff] }
  0x5f   : > { %498 = vmatpush1.xpose.msra.mxu0 %v339_v17  ;;  %v1318_v17 = vld [vmem:[%s2162_s3 + $0xc0] sm:$0xff]  ;;  %v1323_v37 = vld [vmem:[%s2162_s3 + $0xe8] sm:$0xff]  ;;  %v1324_v41 = vld [vmem:[%s2162_s3 + $0xf0] sm:$0xff] }
  0x60   : > { %499 = vmatprep.subr.mxu0 %v338_v18  ;;  %420 = vperm.xlu0 %1381, %v390_v45   ;;  %v369_v18 = vld [vmem:[%s1631_s13 + $0x170] sm:$0xff]  ;;  %v358_v40 = vld [vmem:[%s1631_s13 + $0x118] sm:$0xff]  ;;  %v356_v44 = vld [vmem:[%s1631_s13 + $0x108] sm:$0xff] }
  0x61   : > { %v1325_v45 = vld [vmem:[%s2162_s3 + $0xf8] sm:$0xff]  ;;  %v996_v48 = vld [vmem:[%s2163_s4 + $0x70] sm:$0xff] }
  0x62   : > { %415 = vperm.xlu1 %1382, %v389_v51   ;;  %v995_v51 = vld [vmem:[%s2163_s4 + $0x68] sm:$0xff] }
  0x63   : > { %500 = vmatpush1.xpose.msra.mxu0 %v337_v19  ;;  %v987_v19 = vld [vmem:[%s2163_s4 + $0x28] sm:$0xff] }
  0x64   : > { %501 = vmatprep.subr.mxu0 %v336_v21  ;;  %410 = vperm.xlu0 %1381, %v388_v49   ;;  %v1319_v21 = vld [vmem:[%s2162_s3 + $0xc8] sm:$0xff]  ;;  %v291_v49 = vld [vmem:[%s2160_s1] sm:$0xff] }
  0x66   : > { %405 = vperm.xlu1 %1382, %v387_v55   ;;  %v997_v55 = vld [vmem:[%s2163_s4 + $0x78] sm:$0xff] }
  0x67   : > { %502 = vmatpush1.xpose.msra.mxu0 %v335_v23  ;;  %v988_v23 = vld [vmem:[%s2163_s4 + $0x30] sm:$0xff] }
  0x68   : > { %503 = vmatprep.subr.mxu0 %v334_v24  ;;  %711 = vperm.xlu0 %1381, %v1310_v53   ;;  %v366_v24 = vld [vmem:[%s1631_s13 + $0x158] sm:$0xff]  ;;  %v293_v53 = vld [vmem:[%s2160_s1 + $0x10] sm:$0xff] }
  0x6a   : > { %716 = vperm.xlu1 %1382, %v1311_v59   ;;  %v300_v59 = vld [vmem:[%s2160_s1 + $0x48] sm:$0xff] }
  0x6b   : > { %504 = vmatpush1.xpose.msra.mxu0 %v333_v26  ;;  %v365_v26 = vld [vmem:[%s1631_s13 + $0x150] sm:$0xff] }
  0x6c   : > { %505 = vmatprep.subr.mxu0 %v332_v27  ;;  %721 = vperm.xlu0 %1381, %v1312_v57   ;;  %v989_v27 = vld [vmem:[%s2163_s4 + $0x38] sm:$0xff] }
  0x6d   : > { %v298_v57 = vld [vmem:[%s2160_s1 + $0x38] sm:$0xff] }
  0x6e   : > { %726 = vperm.xlu1 %1382, %v1313_v63   ;;  %v304_v63 = vld [vmem:[%s2160_s1 + $0x68] sm:$0xff] }
  0x6f   : > { %506 = vmatpush1.xpose.msra.mxu0 %v331_v30  ;;  %v363_v30 = vld [vmem:[%s1631_s13 + $0x140] sm:$0xff] }
  0x70   : > { %507 = vmatprep.subr.mxu0 %v330_v31  ;;  %1000 = vperm.xlu0 %1381, %v982_v61   ;;  %v990_v31 = vld [vmem:[%s2163_s4 + $0x40] sm:$0xff]  ;;  %v302_v61 = vld [vmem:[%s2160_s1 + $0x58] sm:$0xff] }
  0x72   : > { %1005 = vperm.xlu1 %1382, %v983_v3   ;;  %v308_v3 = vld [vmem:[%s2160_s1 + $0x88] sm:$0xff] }
  0x73   : > { %508 = vmatpush1.xpose.msra.mxu0 %v329_v34  ;;  %v361_v34 = vld [vmem:[%s1631_s13 + $0x130] sm:$0xff] }
  0x74   : > { %509 = vmatprep.subr.mxu0 %v328_v35  ;;  %731 = vperm.xlu0 %1381, %v1314_v1   ;;  %v991_v35 = vld [vmem:[%s2163_s4 + $0x48] sm:$0xff]  ;;  %v306_v1 = vld [vmem:[%s2160_s1 + $0x78] sm:$0xff] }
  0x76   : > { %1010 = vperm.xlu1 %1382, %v984_v7   ;;  %v312_v7 = vld [vmem:[%s2160_s1 + $0xa8] sm:$0xff] }
  0x77   : > { %510 = vmatpush1.xpose.msra.mxu0 %v327_v38  ;;  %v359_v38 = vld [vmem:[%s1631_s13 + $0x120] sm:$0xff] }
  0x78   : > { %511 = vmatprep.subr.mxu0 %v326_v39  ;;  %736 = vperm.xlu0 %1381, %v1315_v5   ;;  %v992_v39 = vld [vmem:[%s2163_s4 + $0x50] sm:$0xff]  ;;  %v310_v5 = vld [vmem:[%s2160_s1 + $0x98] sm:$0xff] }
  0x7a   : > { %1015 = vperm.xlu1 %1382, %v985_v11   ;;  %v316_v11 = vld [vmem:[%s2160_s1 + $0xc8] sm:$0xff] }
  0x7b   : > { %512 = vmatpush1.xpose.msra.mxu0 %v325_v42  ;;  %v357_v42 = vld [vmem:[%s1631_s13 + $0x110] sm:$0xff] }
  0x7c   : > { %513 = vmatprep.subr.mxu0 %v324_v43  ;;  %741 = vperm.xlu0 %1381, %v1316_v9   ;;  %v993_v43 = vld [vmem:[%s2163_s4 + $0x58] sm:$0xff] }
  0x7d   : > { %v314_v9 = vld [vmem:[%s2160_s1 + $0xb8] sm:$0xff] }
  0x7e   : > { %1020 = vperm.xlu1 %1382, %v986_v15   ;;  %v320_v15 = vld [vmem:[%s2160_s1 + $0xe8] sm:$0xff] }
  0x7f   : > { %514 = vmatpush1.xpose.msra.mxu0 %v323_v46  ;;  %v355_v46 = vld [vmem:[%s1631_s13 + $0x100] sm:$0xff] }
  0x80   : > { %515 = vmatprep.subr.mxu0 %v386_v47  ;;  %746 = vperm.xlu0 %1381, %v1317_v13   ;;  %v994_v47 = vld [vmem:[%s2163_s4 + $0x60] sm:$0xff]  ;;  %v318_v13 = vld [vmem:[%s2160_s1 + $0xd8] sm:$0xff] }
  0x82   : > { %1025 = vperm.xlu1 %1382, %v987_v19   ;;  %v1487_v19 = vmov 0.0  }
  0x83   : > { %516 = vmatpush2.xpose.msra.mxu0 %v385_v50  ;;  %v294_v50 = vld [vmem:[%s2160_s1 + $0x18] sm:$0xff]  ;;  %853 = vmatprep.mubr.f32.mxu1 %v1487_v19 }
  0x84   : > { %517 = vmatprep.subr.mxu0 %v384_v52  ;;  %751 = vperm.xlu0 %1381, %v1318_v17   ;;  %v1152_v52 = vld [vmem:[#allocation2] sm:$0x1]  ;;  %v322_v17 = vld [vmem:[%s2160_s1 + $0xf8] sm:$0xff] }
  0x86   : > { %1030 = vperm.xlu1 %1382, %v988_v23  }
  0x87   : > { %518 = vmatpush2.xpose.msra.mxu0 %v383_v54  ;;  %v296_v54 = vld [vmem:[%s2160_s1 + $0x28] sm:$0xff] }
  0x88   : > { %519 = vmatprep.subr.mxu0 %v382_v56  ;;  %756 = vperm.xlu0 %1381, %v1319_v21   ;;  %v295_v56 = vld [vmem:[%s2160_s1 + $0x20] sm:$0xff] }
  0x8a   : > { %1035 = vperm.xlu1 %1382, %v989_v27  }
  0x8b   : > { %520 = vmatpush2.xpose.msra.mxu0 %v381_v58  ;;  %v297_v58 = vld [vmem:[%s2160_s1 + $0x30] sm:$0xff] }
  0x8c   : > { %521 = vmatprep.subr.mxu0 %v380_v60  ;;  %761 = vperm.xlu0 %1381, %v1320_v25   ;;  %v299_v60 = vld [vmem:[%s2160_s1 + $0x40] sm:$0xff] }
  0x8e   : > { %1040 = vperm.xlu1 %1382, %v990_v31  }
  0x8f   : > { %522 = vmatpush2.xpose.msra.mxu0 %v379_v62  ;;  %v301_v62 = vld [vmem:[%s2160_s1 + $0x50] sm:$0xff] }
  0x90   : > { %523 = vmatprep.subr.mxu0 %v378_v0  ;;  %766 = vperm.xlu0 %1381, %v1321_v29   ;;  %v303_v0 = vld [vmem:[%s2160_s1 + $0x60] sm:$0xff] }
  0x92   : > { %1045 = vperm.xlu1 %1382, %v991_v35  }
  0x93   : > { %524 = vmatpush2.xpose.msra.mxu0 %v377_v2  ;;  %v305_v2 = vld [vmem:[%s2160_s1 + $0x70] sm:$0xff] }
  0x94   : > { %525 = vmatprep.subr.mxu0 %v376_v4  ;;  %771 = vperm.xlu0 %1381, %v1322_v33   ;;  %v307_v4 = vld [vmem:[%s2160_s1 + $0x80] sm:$0xff] }
  0x96   : > { %1050 = vperm.xlu1 %1382, %v992_v39  }
  0x97   : > { %526 = vmatpush2.xpose.msra.mxu0 %v375_v6  ;;  %v309_v6 = vld [vmem:[%s2160_s1 + $0x90] sm:$0xff] }
  0x98   : > { %527 = vmatprep.subr.mxu0 %v374_v8  ;;  %776 = vperm.xlu0 %1381, %v1323_v37   ;;  %v311_v8 = vld [vmem:[%s2160_s1 + $0xa0] sm:$0xff] }
  0x9a   : > { %1055 = vperm.xlu1 %1382, %v993_v43  }
  0x9b   : > { %528 = vmatpush2.xpose.msra.mxu0 %v373_v10  ;;  %v313_v10 = vld [vmem:[%s2160_s1 + $0xb0] sm:$0xff] }
  0x9c   : > { %529 = vmatprep.subr.mxu0 %v372_v12  ;;  %781 = vperm.xlu0 %1381, %v1324_v41   ;;  %v315_v12 = vld [vmem:[%s2160_s1 + $0xc0] sm:$0xff] }
  0x9e   : > { %1060 = vperm.xlu1 %1382, %v994_v47  }
  0x9f   : > { %530 = vmatpush2.xpose.msra.mxu0 %v371_v14  ;;  %v317_v14 = vld [vmem:[%s2160_s1 + $0xd0] sm:$0xff] }
  0xa0   : > { %531 = vmatprep.subr.mxu0 %v370_v16  ;;  %786 = vperm.xlu0 %1381, %v1325_v45   ;;  %v319_v16 = vld [vmem:[%s2160_s1 + $0xe0] sm:$0xff] }
  0xa2   : > { %1065 = vperm.xlu1 %1382, %v995_v51  }
  0xa3   : > { %532 = vmatpush2.xpose.msra.mxu0 %v369_v18  ;;  %v321_v18 = vld [vmem:[%s2160_s1 + $0xf0] sm:$0xff] }
  0xa4   : > { %533 = vmatprep.subr.mxu0 %v368_v20  ;;  %1070 = vperm.xlu0 %1381, %v996_v48  }
  0xa6   : > { %1075 = vperm.xlu1 %1382, %v997_v55  }
  0xa7   : > { %534 = vmatpush2.xpose.msra.mxu0 %v367_v22 }
  0xa8   : > { %535 = vmatprep.subr.mxu0 %v366_v24  ;;  %1155 = vperm.xlu0 %1381, %v1152_v52  }
  0xab   : > { %536 = vmatpush2.xpose.msra.mxu0 %v365_v26 }
  0xac   : > { %537 = vmatprep.subr.mxu0 %v364_v28 }
  0xaf   : > { %538 = vmatpush2.xpose.msra.mxu0 %v363_v30 }
  0xb0   : > { %539 = vmatprep.subr.mxu0 %v362_v32 }
  0xb3   : > { %540 = vmatpush2.xpose.msra.mxu0 %v361_v34 }
  0xb4   : > { %541 = vmatprep.subr.mxu0 %v360_v36 }
  0xb7   : > { %542 = vmatpush2.xpose.msra.mxu0 %v359_v38 }
  0xb8   : > { %543 = vmatprep.subr.mxu0 %v358_v40 }
  0xbb   : > { %544 = vmatpush2.xpose.msra.mxu0 %v357_v42 }
  0xbc   : > { %545 = vmatprep.subr.mxu0 %v356_v44 }
  0xbf   : > { %546 = vmatpush2.xpose.msra.mxu0 %v355_v46 }
  0xc2   : > { %548 = vmatmul.mubr.f32.vlgmr.msra.gmra.mxu0 %v291_v49 }
  0xc3   : > { %553 = vmatprep.mubr.f32.mxu0 %v294_v50  ;;  %v481_v43 = vpop.permute.xlu0 %480 }
  0xc5   : > { %v471_v45 = vpop.permute.xlu1 %470 }
  0xc6   : > { %554 = vmatmul.mubr.f32.gmra.mxu0 %v293_v53 }
  0xc7   : > { %559 = vmatprep.mubr.f32.mxu0 %v296_v54  ;;  %v476_v48 = vpop.permute.xlu0 %475 }
  0xc9   : > { %v466_v50 = vpop.permute.xlu1 %465 }
  0xca   : > { %560 = vmatmul.mubr.f32.gmra.mxu0 %v295_v56 }
  0xcb   : > { %565 = vmatprep.mubr.f32.mxu0 %v298_v57  ;;  %v461_v53 = vpop.permute.xlu0 %460 }
  0xcd   : > { %v456_v55 = vpop.permute.xlu1 %455 }
  0xce   : > { %566 = vmatmul.mubr.f32.gmra.mxu0 %v297_v58 }
  0xcf   : > { %571 = vmatprep.mubr.f32.mxu0 %v300_v59 }
  0xd2   : > { %572 = vmatmul.mubr.f32.gmra.mxu0 %v299_v60 }
  0xd3   : > { %577 = vmatprep.mubr.f32.mxu0 %v302_v61  ;;  %v451_v61 = vpop.permute.xlu0 %450 }
  0xd6   : > { %578 = vmatmul.mubr.f32.gmra.mxu0 %v301_v62 }
  0xd7   : > { %583 = vmatprep.mubr.f32.mxu0 %v304_v63  ;;  %v446_v63 = vpop.permute.xlu1 %445 }
  0xda   : > { %584 = vmatmul.mubr.f32.gmra.mxu0 %v303_v0 }
  0xdb   : > { %589 = vmatprep.mubr.f32.mxu0 %v306_v1 }
  0xde   : > { %590 = vmatmul.mubr.f32.gmra.mxu0 %v305_v2 }
  0xdf   : > { %595 = vmatprep.mubr.f32.mxu0 %v308_v3 }
  0xe2   : > { %596 = vmatmul.mubr.f32.gmra.mxu0 %v307_v4 }
  0xe3   : > { %601 = vmatprep.mubr.f32.mxu0 %v310_v5 }
  0xe6   : > { %602 = vmatmul.mubr.f32.gmra.mxu0 %v309_v6 }
  0xe7   : > { %607 = vmatprep.mubr.f32.mxu0 %v312_v7 }
  0xea   : > { %608 = vmatmul.mubr.f32.gmra.mxu0 %v311_v8 }
  0xeb   : > { %613 = vmatprep.mubr.f32.mxu0 %v314_v9 }
  0xee   : > { %614 = vmatmul.mubr.f32.gmra.mxu0 %v313_v10  ;;  %v441_v10 = vpop.permute.xlu0 %440 }
  0xef   : > { %619 = vmatprep.mubr.f32.mxu0 %v316_v11 }
  0xf2   : > { %620 = vmatmul.mubr.f32.gmra.mxu0 %v315_v12 }
  0xf3   : > { %625 = vmatprep.mubr.f32.mxu0 %v318_v13  ;;  %v436_v13 = vpop.permute.xlu1 %435 }
  0xf6   : > { %626 = vmatmul.mubr.f32.gmra.mxu0 %v317_v14 }
  0xf7   : > { %631 = vmatprep.mubr.f32.mxu0 %v320_v15 }
  0xfa   : > { %632 = vmatmul.mubr.f32.gmra.mxu0 %v319_v16 }
  0xfb   : > { %637 = vmatprep.mubr.f32.mxu0 %v322_v17 }
  0xfe   : > { %638 = vmatmul.mubr.f32.gmra.mxu0 %v321_v18 }
 0x182   : > { %v1942_v20 = vpop.f32.mrf.mxu0 }
 0x184   : > { %v1944_v21 = vpop.f32.mrf.mxu0 }
 0x186   : > { %v1946_v22 = vpop.f32.mrf.mxu0 }
 0x188   : > { %v1948_v23 = vpop.f32.mrf.mxu0 }
 0x18a   : > { %v1950_v24 = vpop.f32.mrf.mxu0 }
 0x18c   : > { %v1952_v25 = vpop.f32.mrf.mxu0 }
 0x18e   : > { %v1954_v26 = vpop.f32.mrf.mxu0 }
 0x190   : > { %v1956_v27 = vpop.f32.mrf.mxu0 }
 0x192   : > { %v1958_v28 = vpop.f32.mrf.mxu0 }
 0x194   : > { %v1960_v29 = vpop.f32.mrf.mxu0 }
 0x196   : > { %v1962_v30 = vpop.f32.mrf.mxu0 }
 0x198   : > { %v1964_v31 = vpop.f32.mrf.mxu0 }
 0x19a   : > { %v1966_v32 = vpop.f32.mrf.mxu0 }
 0x19c   : > { %v1968_v33 = vpop.f32.mrf.mxu0 }
 0x19e   : > { %v1970_v34 = vpop.f32.mrf.mxu0 }
 0x1a0   : > { %v1972_v35 = vpop.f32.mrf.mxu0 }
 0x1a2   : > { %v597_v36 = vpop.f32.mrf.mxu0 }
 0x1a4   : > { %v599_v37 = vpop.f32.mrf.mxu0 }
 0x1a6   : > { %v603_v38 = vpop.f32.mrf.mxu0 }
 0x1a8   : > { %v605_v39 = vpop.f32.mrf.mxu0 }
 0x1a9   : > { %v606_v18 = vadd.f32 %v605_v39, %v451_v61 }
 0x1aa   : > { %v609_v40 = vpop.f32.mrf.mxu0 }
 0x1ab   : > { %v610_v16 = vadd.f32 %v609_v40, %v456_v55  ;;  %v592_v40 = vadd.f32 %v1970_v34, %v441_v10 }
 0x1ac   : > { %v611_v41 = vpop.f32.mrf.mxu0 }
 0x1ad   : > { %v612_v14 = vadd.f32 %v611_v41, %v456_v55  ;;  %v594_v41 = vadd.f32 %v1972_v35, %v441_v10  ;;  %v681_v10 = vld [vmem:[%s2161_s2 + $0x28] sm:$0xff] }
 0x1ae   : > { %v615_v42 = vpop.f32.mrf.mxu0 }
 0x1af   : > { %v616_v11 = vadd.f32 %v615_v42, %v461_v53  ;;  %v598_v42 = vadd.f32 %v597_v36, %v446_v63 }
 0x1b0   : > { %v617_v44 = vpop.f32.mrf.mxu0 }
 0x1b1   : > { %v618_v8 = vadd.f32 %v617_v44, %v461_v53  ;;  %v600_v44 = vadd.f32 %v599_v37, %v446_v63  ;;  %v586_v37 = vadd.f32 %v1966_v32, %v436_v13  ;;  %v660_v53 = vmax.f32 %v598_v42, 0.0 }
 0x1b2   : > { %v621_v46 = vpop.f32.mrf.mxu0 }
 0x1b3   : > { %v622_v6 = vadd.f32 %v621_v46, %v466_v50  ;;  %v666_v46 = vmax.f32 %v616_v11, 0.0  ;;  %v682_v11 = vld [vmem:[%s2161_s2 + $0x30] sm:$0xff] }
 0x1b4   : > { %v623_v47 = vpop.f32.mrf.mxu0 }
 0x1b5   : > { %v624_v4 = vadd.f32 %v623_v47, %v466_v50  ;;  %v668_v17 = vmax.f32 %v622_v6, 0.0  ;;  %v665_v47 = vmax.f32 %v612_v14, 0.0  ;;  %v426_v50 = vpop.permute.xlu1 %425  ;;  %v685_v14 = vld [vmem:[%s2161_s2 + $0x48] sm:$0xff] }
 0x1b6   : > { %v627_v49 = vpop.f32.mrf.mxu0 }
 0x1b7   : > { %v628_v2 = vadd.f32 %v627_v49, %v471_v45  ;;  %v669_v15 = vmax.f32 %v624_v4, 0.0  ;;  %v664_v49 = vmax.f32 %v610_v16, 0.0  ;;  %v687_v16 = vld [vmem:[%s2161_s2 + $0x58] sm:$0xff] }
 0x1b8   : > { %v629_v51 = vpop.f32.mrf.mxu0 }
 0x1b9   : > { %v630_v0 = vadd.f32 %v629_v51, %v471_v45  ;;  %v670_v12 = vmax.f32 %v628_v2, 0.0  ;;  %v604_v45 = vadd.f32 %v603_v38, %v451_v61  ;;  %v663_v51 = vmax.f32 %v606_v18, 0.0  ;;  %v416_v34 = vpop.permute.xlu1 %415  ;;  %v689_v18 = vld [vmem:[%s2161_s2 + $0x68] sm:$0xff] }
 0x1ba   : > { %v633_v52 = vpop.f32.mrf.mxu0  ;;  %v588_v38 = vadd.f32 %v1968_v33, %v436_v13  ;;  %v574_v33 = vadd.f32 %v1958_v28, %v426_v50  ;;  %v684_v13 = vld [vmem:[%s2161_s2 + $0x40] sm:$0xff] }
 0x1bb   : > { %v634_v62 = vadd.f32 %v633_v52, %v476_v48  ;;  %v671_v9 = vmax.f32 %v630_v0, 0.0  ;;  %v662_v39 = vmax.f32 %v604_v45, 0.0  ;;  %v661_v52 = vmax.f32 %v600_v44, 0.0  ;;  %v691_v45 = vld [vmem:[%s2161_s2 + $0x78] sm:$0xff] }
 0x1bc   : > { %v635_v54 = vpop.f32.mrf.mxu0  ;;  %v652_v0 = vmax.f32 %v574_v33, 0.0 }
 0x1bd   : > { %v636_v59 = vadd.f32 %v635_v54, %v476_v48  ;;  %v672_v7 = vmax.f32 %v634_v62, 0.0  ;;  %v431_v48 = vpop.permute.xlu0 %430  ;;  %v659_v54 = vmax.f32 %v594_v41, 0.0  ;;  %v406_v28 = vpop.permute.xlu1 %405 }
 0x1be   : > { %v639_v56 = vpop.f32.mrf.mxu0  ;;  %v582_v36 = vadd.f32 %v1964_v31, %v431_v48  ;;  %v580_v35 = vadd.f32 %v1962_v30, %v431_v48  ;;  %v564_v30 = vadd.f32 %v1952_v25, %v416_v34  ;;  %v550_v25 = vadd.f32 %v1942_v20, %v406_v28  ;;  %v677_v20 = vld [vmem:[%s2161_s2 + $0x8] sm:$0xff] }
 0x1bf   : > { %v640_v57 = vadd.f32 %v639_v56, %v481_v43  ;;  %v673_v5 = vmax.f32 %v636_v59, 0.0  ;;  %v658_v56 = vmax.f32 %v592_v40, 0.0  ;;  %v656_v59 = vmax.f32 %v586_v37, 0.0 }
 0x1c0   : > { %v641_v58 = vpop.f32.mrf.mxu0  ;;  %v654_v61 = vmax.f32 %v580_v35, 0.0  ;;  %v649_v4 = vmax.f32 %v564_v30, 0.0 }
 0x1c1   : > { %v642_v60 = vadd.f32 %v641_v58, %v481_v43  ;;  %v674_v3 = vmax.f32 %v640_v57, 0.0  ;;  %v667_v43 = vmax.f32 %v618_v8, 0.0  ;;  %v421_v55 = vpop.permute.xlu0 %420  ;;  %v576_v57 = vadd.f32 %v1960_v29, %v426_v50  ;;  %v679_v8 = vld [vmem:[%s2161_s2 + $0x18] sm:$0xff]  ;;  %v717_v44 = vpop.permute.xlu1 %716 }
 0x1c2   : > { %v657_v58 = vmax.f32 %v588_v38, 0.0  ;;  %v570_v32 = vadd.f32 %v1956_v27, %v421_v55  ;;  %v568_v31 = vadd.f32 %v1954_v26, %v421_v55  ;;  %v562_v29 = vadd.f32 %v1950_v24, %v416_v34 }
 0x1c3   : > { %v675_v1 = vmax.f32 %v642_v60, 0.0  ;;  %v655_v60 = vmax.f32 %v582_v36, 0.0  ;;  %v653_v62 = vmax.f32 %v576_v57, 0.0  ;;  %v552_v26 = vadd.f32 %v1944_v21, %v406_v28  ;;  %v678_v21 = vld [vmem:[%s2161_s2 + $0x10] sm:$0xff] }
 0x1c4   : > { %v651_v2 = vmax.f32 %v570_v32, 0.0 }
 0x1c5   : > { %789 = vmatprep.subr.mxu1 %v675_v1  ;;  %v411_v63 = vpop.permute.xlu0 %410  ;;  %v727_v48 = vpop.permute.xlu1 %726 }
 0x1c6   : > { %790 = vmatpush1.msra.mxu1 %v674_v3  ;;  %v558_v1 = vadd.f32 %v1948_v23, %v411_v63  ;;  %v556_v27 = vadd.f32 %v1946_v22, %v411_v63  ;;  %v650_v3 = vmax.f32 %v568_v31, 0.0  ;;  %v644_v23 = vmax.f32 %v550_v25, 0.0  ;;  %v676_v22 = vld [vmem:[%s2161_s2] sm:$0xff] }
 0x1c7   : > { %791 = vmatprep.subr.mxu1 %v673_v5  ;;  %v648_v5 = vmax.f32 %v562_v29, 0.0 }
 0x1c8   : > { %792 = vmatpush1.msra.mxu1 %v672_v7  ;;  %v647_v24 = vmax.f32 %v558_v1, 0.0  ;;  %v646_v6 = vmax.f32 %v556_v27, 0.0  ;;  %v645_v7 = vmax.f32 %v552_v26, 0.0 }
 0x1c9   : > { %793 = vmatprep.subr.mxu1 %v671_v9  ;;  %v680_v9 = vld [vmem:[%s2161_s2 + $0x20] sm:$0xff] }
 0x1ca   : > { %794 = vmatpush1.msra.mxu1 %v670_v12  ;;  %v683_v12 = vld [vmem:[%s2161_s2 + $0x38] sm:$0xff] }
 0x1cb   : > { %795 = vmatprep.subr.mxu1 %v669_v15  ;;  %v686_v15 = vld [vmem:[%s2161_s2 + $0x50] sm:$0xff] }
 0x1cc   : > { %796 = vmatpush1.msra.mxu1 %v668_v17  ;;  %v688_v17 = vld [vmem:[%s2161_s2 + $0x60] sm:$0xff] }
 0x1cd   : > { %797 = vmatprep.subr.mxu1 %v667_v43  ;;  %v690_v43 = vld [vmem:[%s2161_s2 + $0x70] sm:$0xff] }
 0x1ce   : > { %798 = vmatpush1.msra.mxu1 %v666_v46  ;;  %v712_v46 = vpop.permute.xlu0 %711 }
 0x1cf   : > { %799 = vmatprep.subr.mxu1 %v665_v47 }
 0x1d0   : > { %800 = vmatpush1.msra.mxu1 %v664_v49  ;;  %v1006_v49 = vpop.permute.xlu1 %1005 }
 0x1d1   : > { %801 = vmatprep.subr.mxu1 %v663_v51 }
 0x1d2   : > { %802 = vmatpush1.msra.mxu1 %v662_v39  ;;  %v722_v47 = vpop.permute.xlu0 %721 }
 0x1d3   : > { %803 = vmatprep.subr.mxu1 %v661_v52 }
 0x1d4   : > { %804 = vmatpush1.msra.mxu1 %v660_v53  ;;  %v1011_v41 = vpop.permute.xlu1 %1010 }
 0x1d5   : > { %805 = vmatprep.subr.mxu1 %v659_v54 }
 0x1d6   : > { %806 = vmatpush1.msra.mxu1 %v658_v56  ;;  %v1001_v42 = vpop.permute.xlu0 %1000 }
 0x1d7   : > { %807 = vmatprep.subr.mxu1 %v657_v58 }
 0x1d8   : > { %808 = vmatpush1.msra.mxu1 %v656_v59  ;;  %v2053_v40 = vpop.permute.xlu1 %1015 }
 0x1d9   : > { %809 = vmatprep.subr.mxu1 %v655_v60 }
 0x1da   : > { %810 = vmatpush1.msra.mxu1 %v654_v61  ;;  %v732_v50 = vpop.permute.xlu0 %731 }
 0x1db   : > { %811 = vmatprep.subr.mxu1 %v653_v62 }
 0x1dc   : > { %812 = vmatpush1.msra.mxu1 %v652_v0  ;;  %v2057_v52 = vpop.permute.xlu1 %1020 }
 0x1dd   : > { %813 = vmatprep.subr.mxu1 %v651_v2 }
 0x1de   : > { %814 = vmatpush1.msra.mxu1 %v650_v3  ;;  %v737_v51 = vpop.permute.xlu0 %736 }
 0x1df   : > { %815 = vmatprep.subr.mxu1 %v649_v4 }
 0x1e0   : > { %816 = vmatpush1.msra.mxu1 %v648_v5  ;;  %v2061_v55 = vpop.permute.xlu1 %1025 }
 0x1e1   : > { %817 = vmatprep.subr.mxu1 %v647_v24 }
 0x1e2   : > { %818 = vmatpush1.msra.mxu1 %v646_v6  ;;  %v2055_v39 = vpop.permute.xlu0 %741 }
 0x1e3   : > { %819 = vmatprep.subr.mxu1 %v645_v7 }
 0x1e4   : > { %820 = vmatpush1.msra.mxu1 %v644_v23  ;;  %v2065_v58 = vpop.permute.xlu1 %1030 }
 0x1e5   : > { %854 = vmatmul.mubr.f32.vlgmr.msra.gmra.mxu1 %v676_v22 }
 0x1e6   : > { %859 = vmatprep.mubr.f32.mxu1 %v1487_v19  ;;  %v2059_v53 = vpop.permute.xlu0 %746 }
 0x1e8   : > { %v2069_v31 = vpop.permute.xlu1 %1035 }
 0x1e9   : > { %860 = vmatmul.mubr.f32.gmra.mxu1 %v677_v20 }
 0x1ea   : > { %865 = vmatprep.mubr.f32.mxu1 %v1487_v19  ;;  %v2063_v56 = vpop.permute.xlu0 %751 }
 0x1ec   : > { %v2073_v27 = vpop.permute.xlu1 %1040 }
 0x1ed   : > { %866 = vmatmul.mubr.f32.gmra.mxu1 %v678_v21 }
 0x1ee   : > { %871 = vmatprep.mubr.f32.mxu1 %v1487_v19  ;;  %v2067_v59 = vpop.permute.xlu0 %756 }
 0x1f1   : > { %872 = vmatmul.mubr.f32.gmra.mxu1 %v679_v8 }
 0x1f2   : > { %877 = vmatprep.mubr.f32.mxu1 %v1487_v19  ;;  %v2071_v30 = vpop.permute.xlu0 %761 }
 0x1f5   : > { %878 = vmatmul.mubr.f32.gmra.mxu1 %v680_v9 }
 0x1f6   : > { %883 = vmatprep.mubr.f32.mxu1 %v1487_v19  ;;  %v2075_v24 = vpop.permute.xlu0 %766 }
 0x1f9   : > { %884 = vmatmul.mubr.f32.gmra.mxu1 %v681_v10 }
 0x1fa   : > { %889 = vmatprep.mubr.f32.mxu1 %v1487_v19 }
 0x1fd   : > { %890 = vmatmul.mubr.f32.gmra.mxu1 %v682_v11 }
 0x1fe   : > { %895 = vmatprep.mubr.f32.mxu1 %v1487_v19 }
 0x201   : > { %896 = vmatmul.mubr.f32.gmra.mxu1 %v683_v12 }
 0x202   : > { %901 = vmatprep.mubr.f32.mxu1 %v1487_v19 }
 0x205   : > { %902 = vmatmul.mubr.f32.gmra.mxu1 %v684_v13 }
 0x206   : > { %907 = vmatprep.mubr.f32.mxu1 %v1487_v19 }
 0x209   : > { %908 = vmatmul.mubr.f32.gmra.mxu1 %v685_v14 }
 0x20a   : > { %913 = vmatprep.mubr.f32.mxu1 %v1487_v19 }
 0x20d   : > { %914 = vmatmul.mubr.f32.gmra.mxu1 %v686_v15  ;;  %v2077_v15 = vpop.permute.xlu1 %1045 }
 0x20e   : > { %919 = vmatprep.mubr.f32.mxu1 %v1487_v19 }
 0x211   : > { %920 = vmatmul.mubr.f32.gmra.mxu1 %v687_v16 }
 0x212   : > { %925 = vmatprep.mubr.f32.mxu1 %v1487_v19 }
 0x215   : > { %926 = vmatmul.mubr.f32.gmra.mxu1 %v688_v17 }
 0x216   : > { %931 = vmatprep.mubr.f32.mxu1 %v1487_v19 }
 0x219   : > { %932 = vmatmul.mubr.f32.gmra.mxu1 %v689_v18 }
 0x21a   : > { %937 = vmatprep.mubr.f32.mxu1 %v1487_v19 }
 0x21d   : > { %938 = vmatmul.mubr.f32.gmra.mxu1 %v690_v43 }
 0x21e   : > { %943 = vmatprep.mubr.f32.mxu1 %v1487_v19 }
 0x221   : > { %944 = vmatmul.mubr.f32.gmra.mxu1 %v691_v45 }
 0x2a5   : > { %v855_v38 = vpop.f32.mrf.mxu1 }
 0x2a6   : > { %v856_v29 = vadd.f32 %v855_v38, %v712_v46 }
 0x2a7   : > { %v857_v19 = vpop.f32.mrf.mxu1 }
 0x2a8   : > { %v858_v2 = vadd.f32 %v857_v19, %v712_v46  ;;  %v950_v5 = vmax.f32 %v856_v29, 0.0 }
 0x2a9   : > { %v861_v37 = vpop.f32.mrf.mxu1 }
 0x2aa   : > { %v862_v62 = vadd.f32 %v861_v37, %v717_v44  ;;  %v951_v21 = vmax.f32 %v858_v2, 0.0  ;;  %v1078_v13 = vmul.f32 %v1001_v42, %v950_v5 }
 0x2ab   : > { %v863_v36 = vpop.f32.mrf.mxu1 }
 0x2ac   : > { %v864_v0 = vadd.f32 %v863_v36, %v717_v44  ;;  %v952_v3 = vmax.f32 %v862_v62, 0.0  ;;  %v1079_v46 = vmul.f32 %v1001_v42, %v951_v21  ;;  %v1051_v62 = vpop.permute.xlu1 %1050 }
 0x2ad   : > { %v867_v54 = vpop.f32.mrf.mxu1 }
 0x2ae   : > { %v868_v28 = vadd.f32 %v867_v54, %v722_v47  ;;  %v953_v6 = vmax.f32 %v864_v0, 0.0  ;;  %v1080_v8 = vmul.f32 %v1006_v49, %v952_v3 }
 0x2af   : > { %v869_v35 = vpop.f32.mrf.mxu1 }
 0x2b0   : > { %v870_v26 = vadd.f32 %v869_v35, %v722_v47  ;;  %v954_v7 = vmax.f32 %v868_v28, 0.0  ;;  %v1081_v16 = vmul.f32 %v1006_v49, %v953_v6  ;;  %v1110_v38 = vadd.f32 %v1080_v8, %v1078_v13 }
 0x2b1   : > { %v873_v34 = vpop.f32.mrf.mxu1 }
 0x2b2   : > { %v874_v4 = vadd.f32 %v873_v34, %v727_v48  ;;  %v955_v9 = vmax.f32 %v870_v26, 0.0  ;;  %v1082_v17 = vmul.f32 %v1011_v41, %v954_v7  ;;  %v1131_v34 = vadd.f32 %v1081_v16, %v1079_v46 }
 0x2b3   : > { %v875_v57 = vpop.f32.mrf.mxu1 }
 0x2b4   : > { %v876_v23 = vadd.f32 %v875_v57, %v727_v48  ;;  %v956_v10 = vmax.f32 %v874_v4, 0.0  ;;  %v2080_v48 = vpop.permute.xlu0 %771  ;;  %v1083_v19 = vmul.f32 %v1011_v41, %v955_v9  ;;  %v1111_v57 = vadd.f32 %v1110_v38, %v1082_v17 }
 0x2b5   : > { %v879_v33 = vpop.f32.mrf.mxu1 }
 0x2b6   : > { %v880_v22 = vadd.f32 %v879_v33, %v732_v50  ;;  %v957_v18 = vmax.f32 %v876_v23, 0.0 }
 0x2b7   : > { %v881_v32 = vpop.f32.mrf.mxu1 }
 0x2b8   : > { %v882_v11 = vadd.f32 %v881_v32, %v732_v50  ;;  %v958_v43 = vmax.f32 %v880_v22, 0.0  ;;  %v1084_v50 = vmul.f32 %v2053_v40, %v956_v10  ;;  %v1085_v42 = vmul.f32 %v2053_v40, %v957_v18  ;;  %v777_v3 = vpop.permute.xlu0 %776 }
 0x2b9   : > { %v885_v60 = vpop.f32.mrf.mxu1 }
 0x2ba   : > { %v886_v14 = vadd.f32 %v885_v60, %v737_v51  ;;  %v959_v37 = vmax.f32 %v882_v11, 0.0  ;;  %v1112_v29 = vadd.f32 %v1111_v57, %v1084_v50  ;;  %v1056_v11 = vpop.permute.xlu1 %1055 }
 0x2bb   : > { %v887_v61 = vpop.f32.mrf.mxu1 }
 0x2bc   : > { %v888_v44 = vadd.f32 %v887_v61, %v737_v51  ;;  %v960_v54 = vmax.f32 %v886_v14, 0.0  ;;  %v1086_v51 = vmul.f32 %v2057_v52, %v958_v43  ;;  %v782_v43 = vpop.permute.xlu0 %781 }
 0x2bd   : > { %v891_v63 = vpop.f32.mrf.mxu1 }
 0x2be   : > { %v892_v47 = vadd.f32 %v891_v63, %v2055_v39  ;;  %v961_v32 = vmax.f32 %v888_v44, 0.0  ;;  %v1132_v63 = vadd.f32 %v1131_v34, %v1083_v19  ;;  %v1088_v28 = vmul.f32 %v2061_v55, %v960_v54  ;;  %v1061_v34 = vpop.permute.xlu1 %1060 }
 0x2bf   : > { %v893_v1 = vpop.f32.mrf.mxu1  ;;  %v1113_v4 = vadd.f32 %v1112_v29, %v1086_v51 }
 0x2c0   : > { %v894_v35 = vadd.f32 %v893_v1, %v2055_v39  ;;  %v962_v60 = vmax.f32 %v892_v47, 0.0  ;;  %v1087_v39 = vmul.f32 %v2057_v52, %v959_v37  ;;  %v1133_v26 = vadd.f32 %v1132_v63, %v1085_v42 }
 0x2c1   : > { %v897_v25 = vpop.f32.mrf.mxu1  ;;  %v1089_v5 = vmul.f32 %v2061_v55, %v961_v32  ;;  %v1114_v8 = vadd.f32 %v1113_v4, %v1088_v28 }
 0x2c2   : > { %v898_v49 = vadd.f32 %v897_v25, %v2059_v53  ;;  %v963_v1 = vmax.f32 %v894_v35, 0.0  ;;  %v1090_v6 = vmul.f32 %v2065_v58, %v962_v60  ;;  %v1134_v52 = vadd.f32 %v1133_v26, %v1087_v39  ;;  %v787_v60 = vpop.permute.xlu0 %786 }
 0x2c3   : > { %v899_v20 = vpop.f32.mrf.mxu1 }
 0x2c4   : > { %v900_v41 = vadd.f32 %v899_v20, %v2059_v53  ;;  %v964_v2 = vmax.f32 %v898_v49, 0.0  ;;  %v1135_v16 = vadd.f32 %v1134_v52, %v1089_v5  ;;  %v1115_v17 = vadd.f32 %v1114_v8, %v1090_v6 }
 0x2c5   : > { %v903_v12 = vpop.f32.mrf.mxu1 }
 0x2c6   : > { %v904_v61 = vadd.f32 %v903_v12, %v2063_v56  ;;  %v965_v7 = vmax.f32 %v900_v41, 0.0  ;;  %v1092_v9 = vmul.f32 %v2069_v31, %v964_v2 }
 0x2c7   : > { %v905_v45 = vpop.f32.mrf.mxu1 }
 0x2c8   : > { %v906_v40 = vadd.f32 %v905_v45, %v2063_v56  ;;  %v966_v23 = vmax.f32 %v904_v61, 0.0  ;;  %v1091_v56 = vmul.f32 %v2065_v58, %v963_v1  ;;  %v1116_v38 = vadd.f32 %v1115_v17, %v1092_v9 }
 0x2c9   : > { %v909_v36 = vpop.f32.mrf.mxu1 }
 0x2ca   : > { %v910_v25 = vadd.f32 %v909_v36, %v2067_v59  ;;  %v967_v10 = vmax.f32 %v906_v40, 0.0  ;;  %v1094_v18 = vmul.f32 %v2073_v27, %v966_v23  ;;  %v1136_v47 = vadd.f32 %v1135_v16, %v1091_v56 }
 0x2cb   : > { %v911_v33 = vpop.f32.mrf.mxu1 }
 0x2cc   : > { %v912_v22 = vadd.f32 %v911_v33, %v2067_v59  ;;  %v968_v12 = vmax.f32 %v910_v25, 0.0  ;;  %v1093_v59 = vmul.f32 %v2069_v31, %v965_v7  ;;  %v1095_v19 = vmul.f32 %v2073_v27, %v967_v10  ;;  %v1066_v25 = vpop.permute.xlu1 %1065 }
 0x2cd   : > { %v915_v0 = vpop.f32.mrf.mxu1  ;;  %v1117_v35 = vadd.f32 %v1116_v38, %v1094_v18 }
 0x2ce   : > { %v916_v20 = vadd.f32 %v915_v0, %v2071_v30  ;;  %v969_v45 = vmax.f32 %v912_v22, 0.0  ;;  %v1096_v50 = vmul.f32 %v2077_v15, %v968_v12  ;;  %v1137_v31 = vadd.f32 %v1136_v47, %v1093_v59  ;;  %v1071_v22 = vpop.permute.xlu0 %1070 }
 0x2cf   : > { %v917_v53 = vpop.f32.mrf.mxu1 }
 0x2d0   : > { %v918_v55 = vadd.f32 %v917_v53, %v2071_v30  ;;  %v970_v46 = vmax.f32 %v916_v20, 0.0  ;;  %v1097_v57 = vmul.f32 %v2077_v15, %v969_v45  ;;  %v1138_v32 = vadd.f32 %v1137_v31, %v1095_v19  ;;  %v1076_v17 = vpop.permute.xlu1 %1075 }
 0x2d1   : > { %v921_v21 = vpop.f32.mrf.mxu1  ;;  %v1118_v41 = vadd.f32 %v1117_v35, %v1096_v50 }
 0x2d2   : > { %v922_v13 = vadd.f32 %v921_v21, %v2075_v24  ;;  %v971_v37 = vmax.f32 %v918_v55, 0.0  ;;  %v1139_v1 = vadd.f32 %v1138_v32, %v1097_v57 }
 0x2d3   : > { %v923_v14 = vpop.f32.mrf.mxu1 }
 0x2d4   : > { %v924_v58 = vadd.f32 %v923_v14, %v2075_v24  ;;  %v972_v36 = vmax.f32 %v922_v13, 0.0  ;;  %v1098_v24 = vmul.f32 %v1051_v62, %v970_v46  ;;  %v1099_v61 = vmul.f32 %v1051_v62, %v971_v37 }
 0x2d5   : > { %v927_v44 = vpop.f32.mrf.mxu1 }
 0x2d6   : > { %v928_v30 = vadd.f32 %v927_v44, %v2080_v48  ;;  %v973_v42 = vmax.f32 %v924_v58, 0.0  ;;  %v1100_v63 = vmul.f32 %v1056_v11, %v972_v36  ;;  %v1119_v2 = vadd.f32 %v1118_v41, %v1098_v24 }
 0x2d7   : > { %v929_v54 = vpop.f32.mrf.mxu1  ;;  %v1140_v53 = vadd.f32 %v1139_v1, %v1099_v61 }
 0x2d8   : > { %v930_v49 = vadd.f32 %v929_v54, %v2080_v48  ;;  %v974_v51 = vmax.f32 %v928_v30, 0.0  ;;  %v1101_v48 = vmul.f32 %v1056_v11, %v973_v42  ;;  %v1120_v5 = vadd.f32 %v1119_v2, %v1100_v63 }
 0x2d9   : > { %v933_v33 = vpop.f32.mrf.mxu1 }
 0x2da   : > { %v934_v27 = vadd.f32 %v933_v33, %v777_v3  ;;  %v975_v29 = vmax.f32 %v930_v49, 0.0  ;;  %v1102_v40 = vmul.f32 %v1061_v34, %v974_v51  ;;  %v1141_v20 = vadd.f32 %v1140_v53, %v1101_v48 }
 0x2db   : > { %v935_v39 = vpop.f32.mrf.mxu1 }
 0x2dc   : > { %v976_v0 = vmax.f32 %v934_v27, 0.0  ;;  %v936_v28 = vadd.f32 %v935_v39, %v777_v3  ;;  %v1103_v6 = vmul.f32 %v1061_v34, %v975_v29  ;;  %v1121_v21 = vadd.f32 %v1120_v5, %v1102_v40  ;;  %v1156_v34 = vpop.permute.xlu0 %1155 }
 0x2dd   : > { %v939_v26 = vpop.f32.mrf.mxu1  ;;  %v1488_v40 = vmov 1966171168  }
 0x2de   : > { %v977_v15 = vmax.f32 %v936_v28, 0.0  ;;  %v940_v4 = vadd.f32 %v939_v26, %v782_v43  ;;  %v1104_v23 = vmul.f32 %v1066_v25, %v976_v0  ;;  %v1142_v11 = vadd.f32 %v1141_v20, %v1103_v6 }
 0x2df   : > { %v941_v7 = vpop.f32.mrf.mxu1  ;;  %v1186_v26 = vunpack.c.l.s4 %v1488_v40 }
 0x2e0   : > { %v978_v52 = vmax.f32 %v940_v4, 0.0  ;;  %v942_v62 = vadd.f32 %v941_v7, %v782_v43  ;;  %v1105_v3 = vmul.f32 %v1066_v25, %v977_v15  ;;  %v1122_v55 = vadd.f32 %v1121_v21, %v1104_v23 }
 0x2e1   : > { %v945_v8 = vpop.f32.mrf.mxu1  ;;  %v1158_v43 = vlaneseq  ;;  %v1187_v4 = vunpack.c.0.s8 %v1186_v26 }
 0x2e2   : > { %v1106_v56 = vmul.f32 %v1071_v22, %v978_v52  ;;  %v979_v9 = vmax.f32 %v942_v62, 0.0  ;;  %v946_v10 = vadd.f32 %v945_v8, %v787_v60  ;;  %v1143_v59 = vadd.f32 %v1142_v11, %v1105_v3 }
 0x2e3   : > { %v947_v12 = vpop.f32.mrf.mxu1  ;;  %v1159_v30 = vshrl.u32 %v1158_v43, 7  ;;  %vm1202_vm0 = vcmp.lt.s32.totalorder %v1158_v43, 256 }
 0x2e4   : > { %v1107_v13 = vmul.f32 %v1071_v22, %v979_v9  ;;  %v980_v14 = vmax.f32 %v946_v10, 0.0  ;;  %v948_v16 = vadd.f32 %v947_v12, %v787_v60  ;;  %v1123_v18 = vadd.f32 %v1122_v55, %v1106_v56 }
 0x2e5   : > { %v1160_v31 = vsub.s32 0, %v1159_v30  ;;  %v1190_v23 = vsub.s32 %v1187_v4, %v1159_v30 }
 0x2e6   : > { %v1108_v45 = vmul.f32 %v1076_v17, %v980_v14  ;;  %v981_v46 = vmax.f32 %v948_v16, 0.0  ;;  %v1144_v58 = vadd.f32 %v1143_v59, %v1107_v13 }
 0x2e7   : > { %v1161_v42 = vrot.slane %v1156_v34, %v1160_v31 }
 0x2e8   : > { %v1124_v44 = vadd.f32 %v1123_v18, %v1108_v45  ;;  %v1109_v47 = vmul.f32 %v1076_v17, %v981_v46 }
 0x2ea   : > { %v1125_v38 = vrot.slane %v1124_v44, 4  ;;  %v1145_v19 = vadd.f32 %v1144_v58, %v1109_v47 }
 0x2ec   : > { %v1126_v50 = vadd.f32 %v1125_v38, %v1124_v44  ;;  %v1146_v37 = vrot.slane %v1145_v19, 4 }
 0x2ee   : > { %v1127_v36 = vrot.slane %v1126_v50, 2  ;;  %v1147_v54 = vadd.f32 %v1146_v37, %v1145_v19 }
 0x2f0   : > { %v1128_v35 = vadd.f32 %v1127_v36, %v1126_v50  ;;  %v1148_v49 = vrot.slane %v1147_v54, 2 }
 0x2f2   : > { %v1129_v57 = vrot.slane %v1128_v35, 1  ;;  %v1149_v24 = vadd.f32 %v1148_v49, %v1147_v54 }
 0x2f4   : > { %v1130_v51 = vadd.f32 %v1129_v57, %v1128_v35  ;;  %v1150_v33 = vrot.slane %v1149_v24, 1 }
 0x2f6   : > { %v1162_v32 = vadd.f32 %v1161_v42, %v1130_v51  ;;  %v1151_v27 = vadd.f32 %v1150_v33, %v1149_v24 }
 0x2f8   : > { %v1166_v60 = vand.u32 2147483647, %v1162_v32  ;;  %v1163_v41 = vadd.f32 %v1161_v42, %v1151_v27  ;;  %v1164_v5 = vmax.f32 %v1162_v32, 0.0 }
 0x2fa   : > { %v1168_v61 = vsub.f32 0.0, %v1166_v60  ;;  %v1167_v63 = vand.u32 2147483647, %v1163_v41  ;;  %v1165_v6 = vmax.f32 %v1163_v41, 0.0 }
 0x2fc   : > { %v1170_v29 = vmul.f32 1.442695, %v1168_v61  ;;  %v1169_v39 = vsub.f32 0.0, %v1167_v63 }
 0x2fe   : > { %1383 = vpow2.f32 %v1170_v29  ;;  %v1172_v0 = vmul.f32 1.442695, %v1169_v39 }
 0x300   : > { %1385 = vpow2.f32 %v1172_v0 }
 0x30b   : > { %v1384_v28 = vpop.eup %1383 }
 0x30c   : > { %v1174_v1 = vadd.f32 1.0, %v1384_v28 }
 0x30d   : > { %v1386_v2 = vpop.eup %1385 }
 0x30e   : > { %1387 = vlog2.f32 %v1174_v1  ;;  %v1175_v48 = vadd.f32 1.0, %v1386_v2 }
 0x310   : > { %1389 = vlog2.f32 %v1175_v48 }
 0x31b   : > { %v1388_v15 = vpop.eup %1387 }
 0x31c   : > { %v1177_v25 = vmul.f32 0.6931472, %v1388_v15 }
 0x31d   : > { %v1390_v53 = vpop.eup %1389 }
 0x31e   : > { %v1179_v7 = vmul.f32 0.6931472, %v1390_v53  ;;  %v1180_v52 = vadd.f32 %v1177_v25, %v1164_v5 }
 0x320   : > { %v1181_v62 = vadd.f32 %v1179_v7, %v1165_v6 }
 0x322   : > { %v1184_v22 = vcombine.low %v1180_v52, %v1181_v62 }
 0x324   : > { %v1191_v20 = vrot.slane %v1184_v22, %v1190_v23  ;;  %1212 = sbr.rel (!%p1572_p9) target bundleno = 835 (0x343), region = 52 }
 0x326   : > { %v1198_v21 = vrot.slane %v1191_v20, %v1190_v23 }
 0x328   : > { %1204 = vst.msk [vmem:[%s279_s27] sm:$0x3] %vm1202_vm0, %v1198_v21 }
 0x329   : > { %s2179_s18 = smov (!%p1215_p6, %s1214_s18), 2 }
 0x32a   : > { %s2114_s19 = sshll.u32 %s2179_s18, 4 }
 0x32b   : > { %s1219_s20 = ssub.s32 32, %s2114_s19 }
 0x32c   : > { %1220 = vsyncadd %s1206_s14, %s1219_s20  ;;  %p1329_p10 = scmp.ne.s32.totalorder %s2114_s19, 0  ;;  %s1336_s21 = sshll.u32 %s1549_s5, 5 }
 0x32d   : > { %s1223_s11 = scalar_lea.hbm %s2165_s6, %s1336_s21  ;;  %s1225_s12 = sshll.u32 %s279_s27, 4  ;;  %s1226_s12 = int_to_ptr.vmem [resolvable:$true] %s1225_s12 }
 0x32e   : > { %s1417_s13 = scalar_lea.vmem %s1226_s12, %s2114_s19  ;;  %s1489_s8 = smov [#allocation6]  }
 0x32f   : > { %p1418_p9 = scmp.ne.s32.totalorder %s1226_s12, %s1417_s13  ;;  %s1421_s15 = sshll.u32 %s1489_s8, 4  ;;  %s1422_s15 = int_to_ptr.vmem [resolvable:$false] %s1421_s15 }
 0x330   : > { %s1423_s17 = scalar_lea.vmem %s1422_s15, 64  ;;  %p1424_p7 = scmp.lt.s32.totalorder %s1226_s12, %s1422_s15 }
 0x331   : > { %p1419_p11 = pnand %p1418_p9, %p1329_p10  ;;  %p1425_p8 = scmp.lt.s32.totalorder %s1423_s17, %s1417_s13 }
 0x333   : > { %p1420_p13 = pneg %p1419_p11  ;;  %p1426_p12 = por %p1425_p8, %p1424_p7 }
 0x335   : > { %p1427_p0 = pnand %p1426_p12, %p1420_p13 }
 0x337   : > { %1430 = shalt.err (!%p1427_p0)
}
 0x338   : > { %s1431_s5 = scalar_lea.hbm %s1223_s11, %s2114_s19  ;;  %s1435_s16 = scalar_lea.hbm %s2165_s6, 48 }
 0x339   : > { %p1432_p1 = scmp.ne.s32.totalorder %s1223_s11, %s1431_s5  ;;  %p1436_p4 = scmp.lt.s32.totalorder %s1223_s11, %s2165_s6 }
 0x33a   : > { %p1437_p5 = scmp.lt.s32.totalorder %s1435_s16, %s1431_s5 }
 0x33b   : > { %p1433_p3 = pnand %p1432_p1, %p1329_p10 }
 0x33c   : > { %p1438_p6 = por %p1437_p5, %p1436_p4 }
 0x33d   : > { %p1434_p2 = pneg %p1433_p3 }
 0x33f   : > { %p1439_p9 = pnand %p1438_p6, %p1434_p2 }
 0x341   : > { %1442 = shalt.err (!%p1439_p9)
}
 0x342   : > { %1228 = dma.vmem_to_hbm [thread:$0]  (%p1329_p10), %s1226_s12, %s2114_s19, %s1223_s11, %s1206_s14  }
 0x343 PF: > { %s1237_s21 = sand.u32 1, %s1469_s23   ;;  %p2170_p11 = scmp.ne.s32.totalorder %s2169_s10, 0 }
 0x344   : > { %p2171_p13 = scmp.ge.s32.totalorder %s1481_s26, 2  ;;  %s1238_s9 = scalar_lea.sflag [#allocation5], %s1237_s21 }
 0x346   : > { %p1340_p7 = pnand %p2171_p13, %p2170_p11 }
 0x348   : > { %p1341_p8 = pneg %p1340_p7 }
 0x34a   : > { %1464 = dma.done.wait (%p1341_p8), %s1238_s9, 32  }
 0x34b   : > { %1466 = vsyncadd (%p1341_p8), %s1238_s9, 4294967264  ;;  %p21_p12 = scmp.ge.s32.totalorder %s1553_s28, 4   ;;  %s2172_s23 = smov %s1473_s24 }
 0x34c   : > { %s2173_s24 = smov %s1477_s25  ;;  %s2174_s25 = smov %s1565_s7 }
 0x34d   : > { %s2175_s26 = smov %s1553_s28  ;;  %23 = sbr.rel (!%p21_p12) target bundleno = 8 (0x8), region = 90 }
 0x352   :  { %1243 = vsyncpa [#allocation4], 1 }
 0x353   :  { %1245 = vsyncpa [#allocation4 + $0x1], 1 }
 0x354   :  { %1246 = vsyncpa [#allocation5], 1 }
 0x355   :  { %1248 = vsyncpa [#allocation5 + $0x1], 1 }

</bundles_post_ra>
